<compile_context>
chip_gen: v6e
topology: v6e:2x2x1
jax: 0.10.0
libtpu: 0.0.40
codegen_flags: <defaults>
</compile_context>

<pallas_src>
import functools

import jax
import jax.numpy as jnp
from jax.experimental import pallas as pl
from jax.experimental.pallas import tpu as pltpu


def _ce_and_bs_kernel(pred_ref, labels_ref, log_spc_ref, spc_scaled_ref,
                      max_log_spc_ref, out_ref, *, alpha, beta, true_b, tb):
    pred = pred_ref[...].astype(jnp.float32)          # (TB, C) f32 compute
    labels = labels_ref[...]                          # (TB, 1) int32
    log_spc = log_spc_ref[...]                        # (1, C)  f32
    spc_scaled = spc_scaled_ref[...]                  # (1, C)  f32, spc / max(spc) in (0, 1]
    max_log_spc = max_log_spc_ref[...]                # (1, 1)  f32

    b, c = pred.shape

    # --- single exp pass shared by both logsumexps -------------------------
    m = jnp.max(pred, axis=-1, keepdims=True)                         # (TB, 1)
    e = jnp.exp(pred - m)                                             # (TB, C)
    sum_ce = jnp.sum(e, axis=-1, keepdims=True)                       # (TB, 1)
    sum_bs = jnp.sum(e * spc_scaled, axis=-1, keepdims=True)          # (TB, 1)
    lse_ce = m + jnp.log(sum_ce)                                      # (TB, 1)
    lse_bs = m + max_log_spc + jnp.log(sum_bs)                        # (TB, 1)

    # --- target logit via compare + select + reduce (no f32 one-hot) -------
    col_ids = jax.lax.broadcasted_iota(jnp.int32, (b, c), 1)          # (TB, C)
    is_tgt = col_ids == labels                                        # (TB, C) bool
    tgt_logit = jnp.sum(jnp.where(is_tgt, pred, 0.0),
                        axis=-1, keepdims=True)                       # (TB, 1)
    tgt_log_spc = jnp.sum(jnp.where(is_tgt, log_spc, 0.0),
                          axis=-1, keepdims=True)                     # (TB, 1)

    loss = (alpha * (lse_ce - tgt_logit)
            + beta * (lse_bs - tgt_logit - tgt_log_spc))              # (TB, 1)

    # --- mask rows that are only batch padding -----------------------------
    row_ids = pl.program_id(0) * tb + jax.lax.broadcasted_iota(
        jnp.int32, (b, 1), 0)                                         # (TB, 1)
    loss = jnp.where(row_ids < true_b, loss, 0.0)

    # per-tile partial sum, splatted into a lane-dense output block
    partial = jnp.sum(loss)
    out_ref[...] = jnp.broadcast_to(partial, out_ref.shape)


def _choose_tb(b, c, itemsize):
    # ~2 MiB per pred input block; with Pallas double-buffering (x2) plus f32
    # temporaries this stays comfortably under the tightest scoped-VMEM
    # budgets (v5e 16 MiB default, v7x 32 MiB scoped / 64 MiB physical).
    budget = 2 * 1024 * 1024
    tb = budget // max(1, c * itemsize)
    tb = max(8, (tb // 8) * 8)
    b_pad8 = ((b + 7) // 8) * 8
    return max(8, min(tb, b_pad8, 1024))


def ce_and_bs_loss(pred, labels, sample_per_class, alpha=0.5, beta=0.5, tb=None):
    """pred: (B, C) float (any dtype, e.g. bf16); labels: (B,) int;
    sample_per_class: (C,) positive counts."""
    b, c = pred.shape

    # Hoisted tiny precomputations (kept out of the per-tile kernel body).
    spc = sample_per_class.astype(jnp.float32).reshape(1, c)
    log_spc = jnp.log(spc)                                    # (1, C)
    max_log_spc = jnp.max(log_spc).reshape(1, 1)              # (1, 1)
    spc_scaled = jnp.exp(log_spc - max_log_spc)               # (1, C) in (0, 1]

    if tb is None:
        tb = _choose_tb(b, c, jnp.dtype(pred.dtype).itemsize)
    b_pad = ((b + tb - 1) // tb) * tb
    num_tiles = b_pad // tb

    if b_pad != b:
        pred = jnp.pad(pred, ((0, b_pad - b), (0, 0)))
        labels = jnp.pad(labels, ((0, b_pad - b),))
    labels_2d = labels.reshape(b_pad, 1).astype(jnp.int32)

    kernel = functools.partial(
        _ce_and_bs_kernel,
        alpha=float(alpha), beta=float(beta), true_b=b, tb=tb)

    partials = pl.pallas_call(
        kernel,
        out_shape=jax.ShapeDtypeStruct((num_tiles, 8, 128), jnp.float32),
        grid=(num_tiles,),
        in_specs=[
            pl.BlockSpec((tb, c), lambda i: (i, 0)),      # pred (native dtype)
            pl.BlockSpec((tb, 1), lambda i: (i, 0)),      # labels
            pl.BlockSpec((1, c), lambda i: (0, 0)),       # log(spc)
            pl.BlockSpec((1, c), lambda i: (0, 0)),       # spc / max(spc)
            pl.BlockSpec((1, 1), lambda i: (0, 0)),       # max(log spc)
        ],
        out_specs=pl.BlockSpec((1, 8, 128), lambda i: (i, 0, 0)),
        compiler_params=pltpu.CompilerParams(
            dimension_semantics=("parallel",),
            vmem_limit_bytes=32 * 1024 * 1024),
    )(pred, labels_2d, log_spc, spc_scaled, max_log_spc)

    # tiny wrapper-side reduction over num_tiles scalars, mean over true B
    return jnp.sum(partials[:, 0, 0]) / b


def _reference_loss(pred, labels, spc, alpha=0.5, beta=0.5):
    """Pure-JAX reference matching torch F.cross_entropy (mean reduction)."""
    pred = pred.astype(jnp.float32)
    spc = spc.astype(jnp.float32)

    def ce(logits):
        logp = jax.nn.log_softmax(logits, axis=-1)
        return -jnp.mean(jnp.take_along_axis(logp, labels[:, None], axis=-1))

    return alpha * ce(pred) + beta * ce(pred + jnp.log(spc)[None, :])


if __name__ == "__main__":
    key = jax.random.PRNGKey(0)
    k1, k2, k3 = jax.random.split(key, 3)

    alpha, beta = 0.5, 0.5
    NUM_CLASSES = 10

    # --- check 1: small f32, batch multiple of 8 ---------------------------
    B = 8
    pred = jax.random.normal(k1, (B, NUM_CLASSES), dtype=jnp.float32)
    labels = jax.random.randint(k2, (B,), 0, NUM_CLASSES, dtype=jnp.int32)
    sample_per_class = jax.random.randint(
        k3, (NUM_CLASSES,), 1, 500, dtype=jnp.int32).astype(jnp.float32)

    loss = jax.block_until_ready(
        ce_and_bs_loss(pred, labels, sample_per_class, alpha=alpha, beta=beta))
    ref = _reference_loss(pred, labels, sample_per_class, alpha=alpha, beta=beta)
    assert jnp.allclose(loss, ref, rtol=1e-5, atol=1e-5), (loss, ref)

    # --- check 2: batch not a multiple of the tile (exercises padding mask) --
    B2 = 13
    pred2 = jax.random.normal(k1, (B2, NUM_CLASSES), dtype=jnp.float32)
    labels2 = jax.random.randint(k2, (B2,), 0, NUM_CLASSES, dtype=jnp.int32)
    loss2 = jax.block_until_ready(
        ce_and_bs_loss(pred2, labels2, sample_per_class, alpha=alpha, beta=beta))
    ref2 = _reference_loss(pred2, labels2, sample_per_class, alpha=alpha, beta=beta)
    assert jnp.allclose(loss2, ref2, rtol=1e-5, atol=1e-5), (loss2, ref2)

    # --- check 3: multiple batch tiles with parallel per-tile partial sums ---
    B3 = 32
    pred3 = jax.random.normal(k1, (B3, NUM_CLASSES), dtype=jnp.float32)
    labels3 = jax.random.randint(k2, (B3,), 0, NUM_CLASSES, dtype=jnp.int32)
    loss3 = jax.block_until_ready(
        ce_and_bs_loss(pred3, labels3, sample_per_class,
                       alpha=alpha, beta=beta, tb=8))
    ref3 = _reference_loss(pred3, labels3, sample_per_class, alpha=alpha, beta=beta)
    assert jnp.allclose(loss3, ref3, rtol=1e-5, atol=1e-5), (loss3, ref3)

    print("KERNEL_OK")
</pallas_src>

<mosaic_0001>
module attributes {stable_mosaic.version = 11 : i64} {
  func.func @_ce_and_bs_kernel(%arg0: i32, %arg1: memref<8x10xf32, #tpu.memory_space<vmem>>, %arg2: memref<8x1xi32, #tpu.memory_space<vmem>>, %arg3: memref<1x10xf32, #tpu.memory_space<vmem>>, %arg4: memref<1x10xf32, #tpu.memory_space<vmem>>, %arg5: memref<1x1xf32, #tpu.memory_space<vmem>>, %arg6: memref<1x8x128xf32, #tpu.memory_space<vmem>>) attributes {dimension_semantics = [#tpu.dimension_semantics<parallel>], iteration_bounds = array<i64: 1>, scalar_prefetch = 0 : i64, scratch_operands = 0 : i64, tpu.core_type = #tpu.core_type<tc>, window_params = [{transform_indices = @transform_0, window_bounds = array<i64: 8, 10>}, {transform_indices = @transform_1, window_bounds = array<i64: 8, 1>}, {pipeline_mode = #tpu.pipeline_mode<synchronous>, transform_indices = @transform_2, window_bounds = array<i64: 1, 10>}, {pipeline_mode = #tpu.pipeline_mode<synchronous>, transform_indices = @transform_3, window_bounds = array<i64: 1, 10>}, {pipeline_mode = #tpu.pipeline_mode<synchronous>, transform_indices = @transform_4, window_bounds = array<i64: 1, 1>}, {transform_indices = @transform_5, window_bounds = array<i64: 1, 8, 128>}]} {
    %c0 = arith.constant 0 : index
    %c0_0 = arith.constant 0 : index
    %0 = vector.load %arg1[%c0, %c0_0] : memref<8x10xf32, #tpu.memory_space<vmem>>, vector<8x10xf32>
    %c0_1 = arith.constant 0 : index
    %c0_2 = arith.constant 0 : index
    %1 = vector.load %arg2[%c0_1, %c0_2] : memref<8x1xi32, #tpu.memory_space<vmem>>, vector<8x1xi32>
    %c0_3 = arith.constant 0 : index
    %c0_4 = arith.constant 0 : index
    %2 = vector.load %arg3[%c0_3, %c0_4] : memref<1x10xf32, #tpu.memory_space<vmem>>, vector<1x10xf32>
    %c0_5 = arith.constant 0 : index
    %c0_6 = arith.constant 0 : index
    %3 = vector.load %arg4[%c0_5, %c0_6] : memref<1x10xf32, #tpu.memory_space<vmem>>, vector<1x10xf32>
    %c0_7 = arith.constant 0 : index
    %c0_8 = arith.constant 0 : index
    %4 = vector.load %arg5[%c0_7, %c0_8] : memref<1x1xf32, #tpu.memory_space<vmem>>, vector<1x1xf32>
    %cst = arith.constant dense<0xFF800000> : vector<8xf32>
    %5 = vector.multi_reduction <maximumf>, %0, %cst [1] : vector<8x10xf32> to vector<8xf32>
    %6 = vector.shape_cast %5 : vector<8xf32> to vector<8x1xf32>
    %7 = vector.broadcast %6 : vector<8x1xf32> to vector<8x10xf32>
    %8 = arith.subf %0, %7 : vector<8x10xf32>
    %9 = math.exp %8 : vector<8x10xf32>
    %cst_9 = arith.constant dense<0.000000e+00> : vector<8xf32>
    %10 = vector.multi_reduction <add>, %9, %cst_9 [1] : vector<8x10xf32> to vector<8xf32>
    %11 = vector.shape_cast %10 : vector<8xf32> to vector<8x1xf32>
    %12 = vector.broadcast %3 : vector<1x10xf32> to vector<8x10xf32>
    %13 = arith.mulf %9, %12 : vector<8x10xf32>
    %cst_10 = arith.constant dense<0.000000e+00> : vector<8xf32>
    %14 = vector.multi_reduction <add>, %13, %cst_10 [1] : vector<8x10xf32> to vector<8xf32>
    %15 = vector.shape_cast %14 : vector<8xf32> to vector<8x1xf32>
    %16 = math.log %11 : vector<8x1xf32>
    %17 = arith.addf %6, %16 : vector<8x1xf32>
    %18 = vector.broadcast %4 : vector<1x1xf32> to vector<8x1xf32>
    %19 = arith.addf %6, %18 : vector<8x1xf32>
    %20 = math.log %15 : vector<8x1xf32>
    %21 = arith.addf %19, %20 : vector<8x1xf32>
    %22 = tpu.iota {dimensions = array<i32: 1>} : vector<8x10xi32>
    %23 = vector.broadcast %1 : vector<8x1xi32> to vector<8x10xi32>
    %24 = arith.cmpi eq, %22, %23 : vector<8x10xi32>
    %cst_11 = arith.constant 0.000000e+00 : f32
    %25 = vector.broadcast %cst_11 : f32 to vector<8x10xf32>
    %26 = arith.select %24, %0, %25 : vector<8x10xi1>, vector<8x10xf32>
    %cst_12 = arith.constant dense<0.000000e+00> : vector<8xf32>
    %27 = vector.multi_reduction <add>, %26, %cst_12 [1] : vector<8x10xf32> to vector<8xf32>
    %28 = vector.shape_cast %27 : vector<8xf32> to vector<8x1xf32>
    %cst_13 = arith.constant 0.000000e+00 : f32
    %29 = vector.shape_cast %2 : vector<1x10xf32> to vector<1x10xf32>
    %30 = vector.broadcast %29 : vector<1x10xf32> to vector<8x10xf32>
    %31 = vector.broadcast %cst_13 : f32 to vector<8x10xf32>
    %32 = arith.select %24, %30, %31 : vector<8x10xi1>, vector<8x10xf32>
    %cst_14 = arith.constant dense<0.000000e+00> : vector<8xf32>
    %33 = vector.multi_reduction <add>, %32, %cst_14 [1] : vector<8x10xf32> to vector<8xf32>
    %34 = vector.shape_cast %33 : vector<8xf32> to vector<8x1xf32>
    %35 = arith.subf %17, %28 : vector<8x1xf32>
    %cst_15 = arith.constant 5.000000e-01 : f32
    %36 = vector.broadcast %cst_15 : f32 to vector<8x1xf32>
    %37 = arith.mulf %36, %35 : vector<8x1xf32>
    %38 = arith.subf %21, %28 : vector<8x1xf32>
    %39 = arith.subf %38, %34 : vector<8x1xf32>
    %cst_16 = arith.constant 5.000000e-01 : f32
    %40 = vector.broadcast %cst_16 : f32 to vector<8x1xf32>
    %41 = arith.mulf %40, %39 : vector<8x1xf32>
    %42 = arith.addf %37, %41 : vector<8x1xf32>
    %c8_i32 = arith.constant 8 : i32
    %43 = arith.muli %arg0, %c8_i32 : i32
    %44 = tpu.iota {dimensions = array<i32: 0>} : vector<8x1xi32>
    %45 = vector.broadcast %43 : i32 to vector<8x1xi32>
    %46 = arith.addi %45, %44 : vector<8x1xi32>
    %c8_i32_17 = arith.constant 8 : i32
    %47 = vector.broadcast %c8_i32_17 : i32 to vector<8x1xi32>
    %48 = arith.cmpi slt, %46, %47 : vector<8x1xi32>
    %cst_18 = arith.constant 0.000000e+00 : f32
    %49 = vector.broadcast %cst_18 : f32 to vector<8x1xf32>
    %50 = arith.select %48, %42, %49 : vector<8x1xi1>, vector<8x1xf32>
    %51 = vector.shape_cast %50 : vector<8x1xf32> to vector<1x8x1xf32>
    %cst_19 = arith.constant dense<0.000000e+00> : vector<1xf32>
    %52 = vector.multi_reduction <add>, %51, %cst_19 [1, 2] : vector<1x8x1xf32> to vector<1xf32>
    %53 = vector.shape_cast %52 : vector<1xf32> to vector<1x1x1xf32>
    %54 = vector.extract %53[0, 0, 0] : f32 from vector<1x1x1xf32>
    %55 = vector.broadcast %54 : f32 to vector<1x8x128xf32>
    %c0_20 = arith.constant 0 : index
    %c0_21 = arith.constant 0 : index
    %c0_22 = arith.constant 0 : index
    %56 = vector.load %arg6[%c0_20, %c0_21, %c0_22] : memref<1x8x128xf32, #tpu.memory_space<vmem>>, vector<1x8x128xf32>
    tpu.vector_store %arg6[%c0_20, %c0_21, %c0_22], %55 {strides = array<i32>} : memref<1x8x128xf32, #tpu.memory_space<vmem>>, vector<1x8x128xf32>,
    return
  }
  func.func @transform_0(%arg0: i32) -> (i32, i32) {
    %c0_i32 = arith.constant 0 : i32
    %c0_i32_0 = arith.constant 0 : i32
    return %arg0, %c0_i32 : i32, i32
  }
  func.func @transform_1(%arg0: i32) -> (i32, i32) {
    %c0_i32 = arith.constant 0 : i32
    %c0_i32_0 = arith.constant 0 : i32
    return %arg0, %c0_i32 : i32, i32
  }
  func.func @transform_2(%arg0: i32) -> (i32, i32) {
    %c0_i32 = arith.constant 0 : i32
    %c0_i32_0 = arith.constant 0 : i32
    %c0_i32_1 = arith.constant 0 : i32
    return %c0_i32, %c0_i32_0 : i32, i32
  }
  func.func @transform_3(%arg0: i32) -> (i32, i32) {
    %c0_i32 = arith.constant 0 : i32
    %c0_i32_0 = arith.constant 0 : i32
    %c0_i32_1 = arith.constant 0 : i32
    return %c0_i32, %c0_i32_0 : i32, i32
  }
  func.func @transform_4(%arg0: i32) -> (i32, i32) {
    %c0_i32 = arith.constant 0 : i32
    %c0_i32_0 = arith.constant 0 : i32
    %c0_i32_1 = arith.constant 0 : i32
    return %c0_i32, %c0_i32_0 : i32, i32
  }
  func.func @transform_5(%arg0: i32) -> (i32, i32, i32) {
    %c0_i32 = arith.constant 0 : i32
    %c0_i32_0 = arith.constant 0 : i32
    %c0_i32_1 = arith.constant 0 : i32
    return %arg0, %c0_i32, %c0_i32_0 : i32, i32, i32
  }
}

</mosaic_0001>

<bundles_post_ra>
// kernel: tpu_custom_call.1
= control target key start
LH: loop header
LB: loop body
LE: loop exit
PB: predicated region body
PF: predicated region fallthrough
CT: control target
= control target key end

     0   :  { %s212_s0 = inlined_call_operand.vmem [shape: f32[8,10], index: 0, kind: input, shape index: {}]   ;;  %s213_s1 = inlined_call_operand.vmem [shape: s32[8,1], index: 1, kind: input, shape index: {}]   ;;  %s214_s2 = inlined_call_operand.vmem [shape: f32[1,10], index: 2, kind: input, shape index: {}]   ;;  %s215_s3 = inlined_call_operand.vmem [shape: f32[1,10], index: 3, kind: input, shape index: {}]   ;;  %s216_s4 = inlined_call_operand.<no memory space> [shape: f32[1,1], index: 4, kind: input, shape index: {}]   ;;  %s217_s5 = inlined_call_operand.hbm [shape: f32[1,8,128], index: 5, kind: output, shape index: {}]  }
   0x1   :  { %v10_v0 = vstv %s216_s4 }
   0x2   :  { %11 = vst [vmem:[#allocation2] sm:$0x1] %v10_v0 }
   0x3   :  { %v23_v1 = vld [vmem:[%s212_s0] sm:$0xff]  ;;  %vm28_vm0 = vcmask 80896   ;;  %v157_v3 = vmov 0  }
   0x4   :  { %v29_v2 = vsel %vm28_vm0, %v23_v1, -inf  ;;  %128 = vset.pattern.permute.xlu0 %v157_v3 }
   0x5   :  { %12 = vsyncpa [#allocation4], 0  ;;  %30 = vmax.xlane.f32.xlu0 %v29_v2  ;;  %v24_v4 = vld [vmem:[%s213_s1] sm:$0xff]  ;;  %v61_v8 = vlaneseq  ;;  %vm94_vm2 = vcmask 7168  }
   0x6   :  { %v121_v9 = vld [vmem:[%s215_s3] ss:$0 sm:$0xff] }
   0x7   :  { %v62_v10 = vand.u32 127, %v61_v8  ;;  %v123_v17 = vld [vmem:[%s214_s2] ss:$0 sm:$0xff]  ;;  %s158_s2 = smov [#allocation3]  }
   0x8   :  { %s113_s3 = sshll.u32 %s158_s2, 4  ;;  %s114_s3 = int_to_ptr.vmem [resolvable:$true] %s113_s3 }
   0x9   :  { %v122_v23 = vld [vmem:[#allocation2] ss:$0 sm:$0xff]  ;;  %s135_s26 = scalar_lea.vmem %s114_s3, 128  ;;  %p140_p1 = scmp.lt.s32.totalorder %s114_s3, %s114_s3 }
   0xa   :  { %p136_p0 = scmp.ne.s32.totalorder %s114_s3, %s135_s26  ;;  %p141_p2 = scmp.lt.s32.totalorder %s135_s26, %s135_s26 }
   0xc   :  { %p142_p3 = por %p141_p2, %p140_p1 }
   0xe   :  { %p143_p4 = pnand %p142_p3, %p136_p0 }
  0x1b   :  { %64 = vperm.xlu0 %128, %v24_v4  }
  0x8e   :  { %v31_v5 = vpop.xlane.xlu0 %30 }
  0x8f   :  { %v32_v6 = vsub.f32 %v23_v1, %v31_v5  ;;  %v57_v26 = vadd.f32 %v122_v23, %v31_v5 }
  0x91   :  { %v33_v7 = vmul.f32 1.442695, %v32_v6 }
  0x93   :  { %129 = vpow2.f32 %v33_v7 }
  0x96   :  { %v65_v12 = vpop.permute.xlu0 %64 }
  0x97   :  { %vm66_vm1 = vcmp.eq.s32.totalorder %v62_v10, %v65_v12 }
  0x98   :  { %v67_v15 = vsel %vm66_vm1, %v23_v1, 0.0  ;;  %v77_v19 = vsel %vm66_vm1, %v123_v17, 0.0 }
  0x99   :  { %v68_v18 = vsel %vm28_vm0, %v67_v15, 0.0  ;;  %v78_v20 = vsel %vm28_vm0, %v77_v19, 0.0 }
  0xa0   :  { %v130_v11 = vpop.eup %129 }
  0xa1   :  { %v44_v13 = vmul.f32 %v130_v11, %v121_v9  ;;  %v35_v16 = vsel %vm28_vm0, %v130_v11, 0.0 }
  0xa3   :  { %v45_v14 = vsel %vm28_vm0, %v44_v13, 0.0 }
  0xa4   :  { %46 = vadd.xlane.f32.xlu1 %v45_v14 }
  0xa8   :  { %36 = vadd.xlane.f32.xlu1 %v35_v16 }
  0xac   :  { %69 = vadd.xlane.f32.xlu1 %v68_v18 }
  0xb0   :  { %79 = vadd.xlane.f32.xlu1 %v78_v20 }
 0x12d   :  { %v47_v21 = vpop.xlane.xlu1 %46 }
 0x12e   :  { %131 = vlog2.f32 %v47_v21 }
 0x131   :  { %v37_v22 = vpop.xlane.xlu1 %36 }
 0x132   :  { %133 = vlog2.f32 %v37_v22 }
 0x135   :  { %v70_v25 = vpop.xlane.xlu1 %69 }
 0x139   :  { %v80_v32 = vpop.xlane.xlu1 %79 }
 0x13b   :  { %v132_v24 = vpop.eup %131 }
 0x13c   :  { %v59_v27 = vmul.f32 0.6931472, %v132_v24 }
 0x13e   :  { %v60_v28 = vadd.f32 %v59_v27, %v57_v26 }
 0x13f   :  { %v134_v29 = vpop.eup %133 }
 0x140   :  { %v49_v30 = vmul.f32 0.6931472, %v134_v29  ;;  %v83_v31 = vsub.f32 %v60_v28, %v70_v25 }
 0x142   :  { %v50_v33 = vadd.f32 %v49_v30, %v31_v5  ;;  %v84_v34 = vsub.f32 %v83_v31, %v80_v32 }
 0x144   :  { %v81_v35 = vsub.f32 %v50_v33, %v70_v25  ;;  %v85_v37 = vmul.f32 0.5, %v84_v34 }
 0x146   :  { %v82_v36 = vmul.f32 0.5, %v81_v35 }
 0x148   :  { %v86_v38 = vadd.f32 %v85_v37, %v82_v36 }
 0x14a   :  { %v95_v39 = vsel %vm94_vm2, %v86_v38, 0.0 }
 0x14b   :  { %96 = vadd.xlane.f32.xlu1 %v95_v39 }
 0x1d4   :  { %v97_v40 = vpop.xlane.xlu1 %96 }
 0x1d5   :  { %v98_v41 = vrot.slane %v97_v40, 4 }
 0x1d7   :  { %v99_v42 = vadd.f32 %v98_v41, %v97_v40 }
 0x1d9   :  { %v100_v43 = vrot.slane %v99_v42, 2 }
 0x1db   :  { %v101_v44 = vadd.f32 %v100_v43, %v99_v42 }
 0x1dd   :  { %v102_v45 = vrot.slane %v101_v44, 1 }
 0x1df   :  { %v103_v46 = vadd.f32 %v102_v45, %v101_v44 }
 0x1e1   :  { %124 = vpush %v103_v46 }
 0x212   :  { %s125_s25 = spop %124 }
 0x213   :  { %v105_v47 = vstv %s125_s25 }
 0x214   :  { %106 = vst [vmem:[#allocation3] sm:$0xff] %v105_v47 }
 0x215   :  { %146 = shalt.err (!%p143_p4)
}
 0x216   :  { %116 = dma.vmem_to_hbm [thread:$0]  %s114_s3, 128, %s217_s5, [#allocation4]  }
 0x217   :  { %155 = dma.done.wait [#allocation4], 128  }
 0x218   :  { %156 = vsyncadd [#allocation4], 4294967168 }
 0x219   :  { %120 = vsyncpa [#allocation4], 1 }

</bundles_post_ra>
